<compile_context>
chip_gen: v6e
topology: v6e:2x2x1
jax: 0.10.0
libtpu: 0.0.40
codegen_flags: <defaults>
</compile_context>

<pallas_src>
import functools

import jax
import jax.numpy as jnp
from jax import lax
from jax.experimental import pallas as pl
from jax.experimental.pallas import tpu as pltpu


# ----------------------------------------------------------------------------
# Generation-aware VMEM limits / tile budget
# ----------------------------------------------------------------------------
def _vmem_limits():
    """(vmem_limit_bytes, per-kernel tile budget).

    Conservative default is safe on v7x (64 MiB VMEM per TensorCore); v5e/v6e
    (128 MiB) get a larger scoped limit so the budget-driven row tile grows.
    """
    try:
        kind = jax.devices()[0].device_kind.lower()
    except Exception:  # pragma: no cover
        kind = ""
    if ("v5" in kind) or ("v6" in kind):
        return 96 * 1024 * 1024, 56 * 1024 * 1024
    return 48 * 1024 * 1024, 28 * 1024 * 1024


_VMEM_LIMIT_BYTES, _TILE_BUDGET_BYTES = _vmem_limits()

_COMPILER_PARAMS = pltpu.CompilerParams(
    dimension_semantics=("parallel", "parallel"),
    vmem_limit_bytes=_VMEM_LIMIT_BYTES,
)


def _fit_rows(H, per_row_bytes, fixed_bytes):
    """Largest row tile (multiple of 8, or H itself) that fits the budget."""
    avail = max(_TILE_BUDGET_BYTES - fixed_bytes, 8 * per_row_bytes)
    th = int(avail // max(per_row_bytes, 1))
    if th >= H:
        return H
    th = max(8, (th // 8) * 8)
    # Prefer a divisor of H (avoids a masked tail tile) if one is close.
    for t in range(th, max(8, th // 2) - 1, -8):
        if H % t == 0:
            return t
    return th


# ----------------------------------------------------------------------------
# Pallas kernels
# ----------------------------------------------------------------------------
def _conv3x3_kernel(*refs, TH, W, H, cins, cout):
    """3x3 'same' conv (+ folded BN bias + ReLU) over a (TH, W) row tile.

    Inputs may arrive as several channel groups (used to fuse the torch.cat of
    the upsampled maps into the first blocks[0] conv).  Per group g:
      xm_g: (1, TH, W, cin_g) main rows
      xt_g: (1, 1,  W, cin_g) top-halo row    (clamped fetch, masked at i==0)
      xb_g: (1, 1,  W, cin_g) bottom-halo row (clamped fetch, masked at last)
    then one weight per group:
      w_g:  (3, 3*cin_g, cout) with w_g[ky][kx*cin_g + c, co] = W[ky,kx,c,co]
    then: bias (1, cout) f32, and o_ref (1, TH, W, cout).
    """
    n = len(cins)
    x_refs = refs[: 3 * n]
    w_refs = refs[3 * n: 4 * n]
    b_ref = refs[4 * n]
    o_ref = refs[4 * n + 1]

    act_dtype = x_refs[0].dtype
    i = pl.program_id(1)
    nh = pl.num_programs(1)
    P = TH * W
    P2 = (TH + 2) * W

    # Column masks for the wrap-around introduced by the flattened +-1 shifts.
    col = lax.broadcasted_iota(jnp.int32, (P2, 1), 0) % W
    mask_l = (col != 0).astype(act_dtype)
    mask_r = (col != (W - 1)).astype(act_dtype)
    # Scalar masks: zero padding at the image top / bottom.
    mt = (i > 0).astype(act_dtype)
    mb = (i < nh - 1).astype(act_dtype)
    tail = (H % TH) != 0
    if tail:
        row = lax.broadcasted_iota(jnp.int32, (P, 1), 0) // W
        valid = ((i * TH + row) < H).astype(act_dtype)

    acc = jnp.zeros((P, cout), jnp.float32)
    for g in range(n):
        cin = cins[g]
        xm_ref, xt_ref, xb_ref = x_refs[3 * g: 3 * g + 3]
        xm = xm_ref[0].reshape(P, cin)
        if tail:
            xm = xm * valid                       # rows past H contribute 0
        top = xt_ref[0, 0] * mt
        bot = xb_ref[0, 0] * mb
        xf = jnp.concatenate([top, xm, bot], axis=0)          # (P2, cin)
        xl = jnp.roll(xf, 1, axis=0) * mask_l                 # left neighbor
        xr = jnp.roll(xf, -1, axis=0) * mask_r                # right neighbor
        # im2col along kx only -> K = 3*cin; the ky taps become 3 contiguous
        # sublane-offset slices (offset ky*W), so no strided patch copies.
        x3 = jnp.concatenate([xl, xf, xr], axis=1)            # (P2, 3*cin)
        w = w_refs[g]
        for ky in range(3):
            acc = acc + jnp.dot(x3[ky * W: ky * W + P, :], w[ky],
                                preferred_element_type=jnp.float32)

    y = jnp.maximum(acc + b_ref[...], 0.0)
    # TODO(synk): for cout < 128 a lane-dense (TH, W*cout) store would pack the
    # epilogue better, but the required lane-collapse reshape is not a
    # guaranteed-supported Mosaic shape cast; realistic BEV configs (>=128
    # channels) are already lane-dense with this layout.
    o_ref[0] = y.reshape(TH, W, cout).astype(o_ref.dtype)


def _deconv_kernel(x_ref, w_ref, b_ref, o_ref, *, TH, W, Cin, S, NCol):
    """ConvTranspose2d(k=s, stride=s) + folded BN bias + ReLU, with the pixel
    shuffle fused into the output layout.

    x_ref: (1, TH, W, Cin) bf16
    w_ref: (S, Cin, S*Cout) bf16;  w_ref[sy][ci, sx*Cout + co] = W[ci,co,sy,sx]
    b_ref: (1, S*Cout) f32 (bias tiled over sx)
    o_ref: (1, TH, S, W, S*Cout); contiguous-identical to the pixel-shuffled
           (TH*S, W*S, Cout) NHWC output.
    """
    xm = x_ref[0].reshape(TH * W, Cin)
    for sy in range(S):
        y = jnp.dot(xm, w_ref[sy], preferred_element_type=jnp.float32)
        y = jnp.maximum(y + b_ref[...], 0.0).astype(o_ref.dtype)
        o_ref[0, :, sy, :, :] = y.reshape(TH, W, NCol)


# ----------------------------------------------------------------------------
# Wrappers
# ----------------------------------------------------------------------------
def conv3x3_bn_relu(xs, w3s, bias, *, out_dtype=jnp.bfloat16):
    """xs: list of (B,H,W,cin_g) bf16; w3s: list of (3, 3*cin_g, cout) bf16;
    bias: (1, cout) f32.  Multiple groups implement a fused channel-concat."""
    assert len(xs) == len(w3s)
    B, H, W, _ = xs[0].shape
    cins = tuple(int(x.shape[-1]) for x in xs)
    cout = int(w3s[0].shape[-1])
    cin_t = sum(cins)
    out_b = jnp.dtype(out_dtype).itemsize
    # Per-row VMEM: double-buffered bf16 input blocks (4 W Cin) + xf/xl/xr/x3
    # temporaries (12 W Cin) + f32 acc/epilogue (8 W Cout) + double-buffered
    # output (2*out_b W Cout).  Weights / halo rows / bias are fixed.
    per_row = W * (16 * cin_t + (8 + 2 * out_b) * cout)
    fixed = 36 * cin_t * cout + 16 * W * cin_t
    TH = _fit_rows(H, per_row, fixed)
    nH = pl.cdiv(H, TH)

    in_specs, args = [], []
    for x, cin in zip(xs, cins):
        in_specs += [
            # main rows of the tile
            pl.BlockSpec((1, TH, W, cin), lambda b, i: (b, i, 0, 0)),
            # top halo row (row i*TH - 1, clamped; masked in-kernel at i==0)
            pl.BlockSpec((1, 1, W, cin),
                         lambda b, i: (b, jnp.maximum(i * TH - 1, 0), 0, 0)),
            # bottom halo row (row i*TH + TH, clamped; masked at last tile)
            pl.BlockSpec((1, 1, W, cin),
                         lambda b, i: (b, jnp.minimum(i * TH + TH, H - 1),
                                       0, 0)),
        ]
        args += [x, x, x]
    for w in w3s:
        in_specs.append(pl.BlockSpec(w.shape, lambda b, i: (0, 0, 0)))
        args.append(w)
    in_specs.append(pl.BlockSpec(bias.shape, lambda b, i: (0, 0)))
    args.append(bias)

    kern = functools.partial(_conv3x3_kernel, TH=TH, W=W, H=H,
                             cins=cins, cout=cout)
    return pl.pallas_call(
        kern,
        out_shape=jax.ShapeDtypeStruct((B, H, W, cout), out_dtype),
        grid=(B, nH),
        in_specs=in_specs,
        out_specs=pl.BlockSpec((1, TH, W, cout), lambda b, i: (b, i, 0, 0)),
        compiler_params=_COMPILER_PARAMS,
    )(*args)


def deconv_bn_relu(x, db, *, out_dtype=jnp.bfloat16):
    """ConvTranspose2d(k=s, stride=s) + BN + ReLU with fused pixel shuffle."""
    B, H, W, Cin = x.shape
    S, cout = int(db["stride"]), int(db["cout"])
    NCol = S * cout
    w, bias = db["w_s"], db["bias_row"]
    out_b = jnp.dtype(out_dtype).itemsize
    per_row = W * (4 * Cin + S * NCol * (8 + 2 * out_b))
    fixed = 4 * S * Cin * NCol
    TH = _fit_rows(H, per_row, fixed)
    nH = pl.cdiv(H, TH)

    kern = functools.partial(_deconv_kernel, TH=TH, W=W, Cin=Cin, S=S,
                             NCol=NCol)
    y = pl.pallas_call(
        kern,
        out_shape=jax.ShapeDtypeStruct((B, H, S, W, NCol), out_dtype),
        grid=(B, nH),
        in_specs=[
            pl.BlockSpec((1, TH, W, Cin), lambda b, i: (b, i, 0, 0)),
            pl.BlockSpec(w.shape, lambda b, i: (0, 0, 0)),
            pl.BlockSpec(bias.shape, lambda b, i: (0, 0)),
        ],
        out_specs=pl.BlockSpec((1, TH, S, W, NCol),
                               lambda b, i: (b, i, 0, 0, 0)),
        compiler_params=_COMPILER_PARAMS,
    )(x, w, bias)
    # (B, H, S, W, S*Cout) is contiguous-identical to the pixel-shuffled NHWC
    # output, so this reshape is metadata-only (no HBM pass).
    return y.reshape(B, H * S, W * S, cout)


def bev_backbone_v1_forward(x_conv4_nchw, x_conv5_nchw, params):
    """Mirrors BaseBEVBackboneV1.forward (inference-mode BN, bf16 compute)."""
    x4 = jnp.transpose(x_conv4_nchw, (0, 2, 3, 1)).astype(jnp.bfloat16)
    x5 = jnp.transpose(x_conv5_nchw, (0, 2, 3, 1)).astype(jnp.bfloat16)

    up0 = deconv_bn_relu(x4, params["deblocks"][0])

    x = x5
    for layer in params["blocks"][1]:
        x = conv3x3_bn_relu([x], [layer["w3"]], layer["bias"])
    up1 = deconv_bn_relu(x, params["deblocks"][1])

    layers0 = params["blocks"][0]
    n0 = len(layers0)
    for li, layer in enumerate(layers0):
        out_dtype = jnp.float32 if li == n0 - 1 else jnp.bfloat16
        if li == 0 and "w3_groups" in layer:
            # torch.cat(ups) fused into the first conv (weight split on Cin).
            x = conv3x3_bn_relu([up0, up1], layer["w3_groups"], layer["bias"],
                                out_dtype=out_dtype)
        elif li == 0:
            x = conv3x3_bn_relu([jnp.concatenate([up0, up1], axis=-1)],
                                [layer["w3"]], layer["bias"],
                                out_dtype=out_dtype)
        else:
            x = conv3x3_bn_relu([x], [layer["w3"]], layer["bias"],
                                out_dtype=out_dtype)

    return jnp.transpose(x, (0, 3, 1, 2))            # NHWC -> NCHW (f32)


# ----------------------------------------------------------------------------
# Parameter init (raw, f32) and preparation (BN folding, bf16, kernel layout)
# ----------------------------------------------------------------------------
def _fold_bn(key, c, eps=1e-3):
    k1, k2, k3, k4 = jax.random.split(key, 4)
    gamma = 1.0 + 0.1 * jax.random.normal(k1, (c,), jnp.float32)
    beta = 0.1 * jax.random.normal(k2, (c,), jnp.float32)
    mean = 0.1 * jax.random.normal(k3, (c,), jnp.float32)
    var = 0.5 + jax.random.uniform(k4, (c,), jnp.float32)
    scale = gamma / jnp.sqrt(var + eps)
    bias = beta - mean * scale
    return scale, bias


def init_raw_params(key, layer_nums, num_filters, num_upsample_filters,
                    upsample_strides):
    blocks, deblocks = [], []
    for idx in range(2):
        F = num_filters[idx]
        layers = []
        for _ in range(layer_nums[idx] + 1):   # pad-conv + layer_nums convs
            key, kw, kb = jax.random.split(key, 3)
            w = 0.05 * jax.random.normal(kw, (3, 3, F, F), jnp.float32)  # HWIO
            scale, bias = _fold_bn(kb, F)
            layers.append({"w": w, "scale": scale, "bias": bias})
        blocks.append(layers)

        U, s = num_upsample_filters[idx], upsample_strides[idx]
        key, kw, kb = jax.random.split(key, 3)
        wt = 0.05 * jax.random.normal(kw, (F, U, s, s), jnp.float32)  # torch CT
        scale, bias = _fold_bn(kb, U)
        deblocks.append({"w": wt, "scale": scale, "bias": bias, "stride": s})
    return {"blocks": blocks, "deblocks": deblocks}


def prepare_params(raw):
    """Fold BN scale into weights, cast to bf16, reshape to kernel layouts."""
    prepared = {"blocks": [], "deblocks": []}
    up_couts = [int(db["w"].shape[1]) for db in raw["deblocks"]]
    for bi, blk in enumerate(raw["blocks"]):
        layers = []
        for li, layer in enumerate(blk):
            w = layer["w"] * layer["scale"][None, None, None, :]   # fold (f32)
            cin, cout = int(w.shape[2]), int(w.shape[3])
            entry = {
                "w3": w.reshape(3, 3 * cin, cout).astype(jnp.bfloat16),
                "w_hwio": w.astype(jnp.bfloat16),                  # reference
                "bias": layer["bias"].reshape(1, cout).astype(jnp.float32),
            }
            if bi == 0 and li == 0 and cin == sum(up_couts):
                groups, off = [], 0
                for u in up_couts:                 # split Cin for fused concat
                    wg = w[:, :, off:off + u, :]
                    groups.append(
                        wg.reshape(3, 3 * u, cout).astype(jnp.bfloat16))
                    off += u
                entry["w3_groups"] = groups
            layers.append(entry)
        prepared["blocks"].append(layers)
    for db in raw["deblocks"]:
        wt = db["w"] * db["scale"][None, :, None, None]            # fold (f32)
        s = int(db["stride"])
        cin, cout = int(wt.shape[0]), int(wt.shape[1])
        # w_s[sy][ci, sx*cout + co] = wt[ci, co, sy, sx]
        w_s = jnp.transpose(wt, (2, 0, 3, 1)).reshape(s, cin, s * cout)
        prepared["deblocks"].append({
            "w_s": w_s.astype(jnp.bfloat16),
            "wt": wt.astype(jnp.bfloat16),                         # reference
            "bias": db["bias"].astype(jnp.float32),
            "bias_row": jnp.tile(db["bias"], s).reshape(1, s * cout)
                           .astype(jnp.float32),
            "stride": s,
            "cout": cout,
        })
    return prepared


# ----------------------------------------------------------------------------
# Pure-JAX reference (same bf16 quantization points, for correctness check)
# ----------------------------------------------------------------------------
def _ref_conv(x, w_hwio, bias, out_dtype):
    y = lax.conv_general_dilated(
        x.astype(jnp.bfloat16), w_hwio, (1, 1), ((1, 1), (1, 1)),
        dimension_numbers=("NHWC", "HWIO", "NHWC"),
        preferred_element_type=jnp.float32)
    return jnp.maximum(y + bias, 0.0).astype(out_dtype)


def _ref_deconv(x, wt, bias, s, out_dtype):
    w_conv = jnp.transpose(wt[:, :, ::-1, ::-1], (2, 3, 0, 1))  # -> HWIO
    y = lax.conv_general_dilated(
        x.astype(jnp.bfloat16), w_conv, (1, 1),
        ((s - 1, s - 1), (s - 1, s - 1)), lhs_dilation=(s, s),
        dimension_numbers=("NHWC", "HWIO", "NHWC"),
        preferred_element_type=jnp.float32)
    return jnp.maximum(y + bias, 0.0).astype(out_dtype)


def reference_forward(x_conv4_nchw, x_conv5_nchw, params):
    x4 = jnp.transpose(x_conv4_nchw, (0, 2, 3, 1)).astype(jnp.bfloat16)
    x5 = jnp.transpose(x_conv5_nchw, (0, 2, 3, 1)).astype(jnp.bfloat16)
    d0 = params["deblocks"][0]
    ups = [_ref_deconv(x4, d0["wt"], d0["bias"], d0["stride"], jnp.bfloat16)]
    x = x5
    for layer in params["blocks"][1]:
        x = _ref_conv(x, layer["w_hwio"], layer["bias"], jnp.bfloat16)
    d1 = params["deblocks"][1]
    ups.append(_ref_deconv(x, d1["wt"], d1["bias"], d1["stride"],
                           jnp.bfloat16))
    x = jnp.concatenate(ups, axis=-1)
    layers0 = params["blocks"][0]
    for li, layer in enumerate(layers0):
        out_dtype = jnp.float32 if li == len(layers0) - 1 else jnp.bfloat16
        x = _ref_conv(x, layer["w_hwio"], layer["bias"], out_dtype)
    return jnp.transpose(x, (0, 3, 1, 2))


# ----------------------------------------------------------------------------
if __name__ == "__main__":
    # Small config consistent with the module's constraints:
    #   num_filters[0] == sum(num_upsample_filters)
    #   H(x_conv4) * stride0 == H(x_conv5) * stride1
    LAYER_NUMS = [1, 1]
    NUM_FILTERS = [64, 32]
    NUM_UPSAMPLE_FILTERS = [32, 32]
    UPSAMPLE_STRIDES = [1, 2]
    B, H4, W4, H5, W5 = 2, 16, 16, 8, 8

    key = jax.random.PRNGKey(0)
    kp, k4, k5 = jax.random.split(key, 3)
    raw = init_raw_params(kp, LAYER_NUMS, NUM_FILTERS, NUM_UPSAMPLE_FILTERS,
                          UPSAMPLE_STRIDES)
    params = prepare_params(raw)
    x_conv4 = jax.random.normal(k4, (B, NUM_FILTERS[0], H4, W4), jnp.float32)
    x_conv5 = jax.random.normal(k5, (B, NUM_FILTERS[1], H5, W5), jnp.float32)

    out = jax.block_until_ready(
        bev_backbone_v1_forward(x_conv4, x_conv5, params))

    assert out.shape == (B, sum(NUM_UPSAMPLE_FILTERS), H4, W4), out.shape
    assert out.dtype == jnp.float32, out.dtype

    ref = jax.block_until_ready(reference_forward(x_conv4, x_conv5, params))
    err = float(jnp.max(jnp.abs(out - ref.astype(jnp.float32))))
    if not jnp.allclose(out, ref.astype(jnp.float32), rtol=3e-2, atol=3e-2):
        raise AssertionError(f"mismatch vs reference, max abs err = {err}")

    print("KERNEL_OK")
</pallas_src>

<mosaic_0001>
module attributes {stable_mosaic.version = 11 : i64} {
  func.func @_deconv_kernel(%arg0: i32, %arg1: i32, %arg2: memref<1x16x16x64xbf16, #tpu.memory_space<vmem>>, %arg3: memref<1x64x32xbf16, #tpu.memory_space<vmem>>, %arg4: memref<1x32xf32, #tpu.memory_space<vmem>>, %arg5: memref<1x16x1x16x32xbf16, #tpu.memory_space<vmem>>) attributes {dimension_semantics = [#tpu.dimension_semantics<parallel>, #tpu.dimension_semantics<parallel>], iteration_bounds = array<i64: 2, 1>, scalar_prefetch = 0 : i64, scratch_operands = 0 : i64, tpu.core_type = #tpu.core_type<tc>, window_params = [{transform_indices = @transform_0, window_bounds = array<i64: 1, 16, 16, 64>}, {pipeline_mode = #tpu.pipeline_mode<synchronous>, transform_indices = @transform_1, window_bounds = array<i64: 1, 64, 32>}, {pipeline_mode = #tpu.pipeline_mode<synchronous>, transform_indices = @transform_2, window_bounds = array<i64: 1, 32>}, {transform_indices = @transform_3, window_bounds = array<i64: 1, 16, 1, 16, 32>}]} {
    %c0 = arith.constant 0 : index
    %c0_0 = arith.constant 0 : index
    %c0_1 = arith.constant 0 : index
    %c0_2 = arith.constant 0 : index
    %0 = vector.load %arg2[%c0, %c0_0, %c0_1, %c0_2] : memref<1x16x16x64xbf16, #tpu.memory_space<vmem>>, vector<1x16x16x64xbf16>
    %1 = vector.shape_cast %0 : vector<1x16x16x64xbf16> to vector<16x16x64xbf16>
    %2 = vector.shape_cast %1 : vector<16x16x64xbf16> to vector<256x64xbf16>
    %c0_3 = arith.constant 0 : index
    %c0_4 = arith.constant 0 : index
    %c0_5 = arith.constant 0 : index
    %3 = vector.load %arg3[%c0_3, %c0_4, %c0_5] : memref<1x64x32xbf16, #tpu.memory_space<vmem>>, vector<1x64x32xbf16>
    %4 = vector.shape_cast %3 : vector<1x64x32xbf16> to vector<64x32xbf16>
    %cst = arith.constant dense<0.000000e+00> : vector<256x32xf32>
    %5 = tpu.matmul %2, %4, %cst {dimension_numbers = #tpu.dot_dimension_numbers<[1], [0], [0], [1], [0, 0, 1, 1], [], []>} : vector<256x64xbf16>, vector<64x32xbf16>, vector<256x32xf32> -> vector<256x32xf32>
    %c0_6 = arith.constant 0 : index
    %c0_7 = arith.constant 0 : index
    %6 = vector.load %arg4[%c0_6, %c0_7] : memref<1x32xf32, #tpu.memory_space<vmem>>, vector<1x32xf32>
    %7 = vector.broadcast %6 : vector<1x32xf32> to vector<256x32xf32>
    %8 = arith.addf %5, %7 : vector<256x32xf32>
    %cst_8 = arith.constant 0.000000e+00 : f32
    %9 = vector.broadcast %cst_8 : f32 to vector<256x32xf32>
    %10 = arith.maximumf %8, %9 : vector<256x32xf32>
    %11 = arith.truncf %10 : vector<256x32xf32> to vector<256x32xbf16>
    %12 = vector.shape_cast %11 : vector<256x32xbf16> to vector<16x16x32xbf16>
    %c0_9 = arith.constant 0 : index
    %c0_10 = arith.constant 0 : index
    %c0_11 = arith.constant 0 : index
    %c0_12 = arith.constant 0 : index
    %c0_13 = arith.constant 0 : index
    %13 = vector.load %arg5[%c0_9, %c0_10, %c0_11, %c0_12, %c0_13] : memref<1x16x1x16x32xbf16, #tpu.memory_space<vmem>>, vector<1x16x1x16x32xbf16>
    %14 = vector.shape_cast %13 : vector<1x16x1x16x32xbf16> to vector<16x16x32xbf16>
    %15 = vector.shape_cast %12 : vector<16x16x32xbf16> to vector<1x16x1x16x32xbf16>
    tpu.vector_store %arg5[%c0_9, %c0_10, %c0_11, %c0_12, %c0_13], %15 {strides = array<i32>} : memref<1x16x1x16x32xbf16, #tpu.memory_space<vmem>>, vector<1x16x1x16x32xbf16>,
    return
  }
  func.func @transform_0(%arg0: i32, %arg1: i32) -> (i32, i32, i32, i32) {
    %c0_i32 = arith.constant 0 : i32
    %c0_i32_0 = arith.constant 0 : i32
    %c0_i32_1 = arith.constant 0 : i32
    return %arg0, %arg1, %c0_i32, %c0_i32_0 : i32, i32, i32, i32
  }
  func.func @transform_1(%arg0: i32, %arg1: i32) -> (i32, i32, i32) {
    %c0_i32 = arith.constant 0 : i32
    %c0_i32_0 = arith.constant 0 : i32
    %c0_i32_1 = arith.constant 0 : i32
    %c0_i32_2 = arith.constant 0 : i32
    return %c0_i32, %c0_i32_0, %c0_i32_1 : i32, i32, i32
  }
  func.func @transform_2(%arg0: i32, %arg1: i32) -> (i32, i32) {
    %c0_i32 = arith.constant 0 : i32
    %c0_i32_0 = arith.constant 0 : i32
    %c0_i32_1 = arith.constant 0 : i32
    return %c0_i32, %c0_i32_0 : i32, i32
  }
  func.func @transform_3(%arg0: i32, %arg1: i32) -> (i32, i32, i32, i32, i32) {
    %c0_i32 = arith.constant 0 : i32
    %c0_i32_0 = arith.constant 0 : i32
    %c0_i32_1 = arith.constant 0 : i32
    %c0_i32_2 = arith.constant 0 : i32
    return %arg0, %arg1, %c0_i32, %c0_i32_0, %c0_i32_1 : i32, i32, i32, i32, i32
  }
}

</mosaic_0001>

<bundles_post_ra>
// kernel: tpu_custom_call.1
= control target key start
LH: loop header
LB: loop body
LE: loop exit
PB: predicated region body
PF: predicated region fallthrough
CT: control target
= control target key end

     0   :  { %8 = vsyncpa [#allocation3], 0  ;;  %s1577_s0 = inlined_call_operand.hbm [shape: bf16[2,16,16,64], index: 0, kind: input, shape index: {}]   ;;  %s1578_s1 = inlined_call_operand.vmem [shape: bf16[1,64,32], index: 1, kind: input, shape index: {}]   ;;  %s1579_s2 = inlined_call_operand.vmem [shape: f32[1,32], index: 2, kind: input, shape index: {}]   ;;  %s1580_s3 = inlined_call_operand.hbm [shape: bf16[2,16,1,16,32], index: 3, kind: output, shape index: {}]  }
   0x1   :  { %10 = vsyncpa [#allocation3 + $0x1], 0 }
   0x2   :  { %11 = vsyncpa [#allocation4], 0 }
   0x3   :  { %13 = vsyncpa [#allocation4 + $0x1], 0  ;;  %s1277_s12 = smov 0   ;;  %s1279_s13 = smov 0  }
   0x4   :  { %s1281_s14 = smov 0   ;;  %s1283_s15 = smov 0  }
   0x5   :  { %s1285_s16 = smov 0   ;;  %s1287_s17 = smov 0  }
   0x6 LB: > { %s869_s18 = sadd.s32 4294967295, %s1249_s17   ;;  %s870_s19 = sadd.s32 4294967294, %s1249_s17   ;;  %s1249_s17 = sphi %s1287_s17, %s19_s17   ;;  %s1245_s16 = sphi %s1285_s16, %s1591_s16   ;;  %s1241_s15 = sphi %s1283_s15, %s1590_s15   ;;  %s1237_s14 = sphi %s1281_s14, %s1589_s14   ;;  %s1233_s13 = sphi %s1279_s13, %s1588_s13   ;;  %s1229_s12 = sphi %s1277_s12, %s1587_s12  }
   0x7   : > { %s31_s20 = sadd.s32 1, %s1245_s16  ;;  %s40_s21 = sadd.s32 1, %s1237_s14 }
   0x8   : > { %p33_p0 = scmp.ge.s32.totalorder %s31_s20, 2  ;;  %p47_p1 = scmp.ne.s32.totalorder %s1237_s14, %s1233_s13 }
   0x9   : > { %p48_p2 = scmp.eq.s32.totalorder %s1249_s17, 0  ;;  %p53_p3 = scmp.ne.s32.totalorder %s1233_s13, %s1229_s12 }
   0xa   : > { %s1593_s20 = smov (%p33_p0, %s31_s20), 0  ;;  %p54_p5 = scmp.eq.s32.totalorder %s869_s18, 0 }
   0xb   : > { %p1318_p4 = por %p48_p2, %p47_p1  ;;  %s35_s23 = ssub.s32 %s1245_s16, %s1593_s20 }
   0xc   : > { %p121_p6 = scmp.eq.s32.totalorder %s869_s18, 1  ;;  %p38_p7 = scmp.eq.s32.totalorder %s35_s23, 0 }
   0xd   : > { %p1324_p8 = por %p54_p5, %p53_p3  ;;  %p127_p10 = scmp.eq.s32.totalorder %s870_s19, 1 }
   0xe   : > { %p1328_p9 = por %p121_p6, %p47_p1  ;;  %p1067_p13 = scmp.lt.s32.totalorder %s1249_s17, 2 }
   0xf   : > { %s1333_s26 = scalar_select %p38_p7, %s1237_s14, %s40_s21  }
  0x10   : > { %p1335_p11 = por %p127_p10, %p53_p3  ;;  %s153_s28 = sand.u32 1, %s1237_s14  }
  0x11   : > { %s873_s29 = sshll.u32 %s153_s28, 7  ;;  %s953_s30 = sshll.u32 %s1245_s16, 11 }
  0x12   : > { %s166_s6 = scalar_lea.hbm %s1577_s0, %s953_s30  ;;  %s157_s7 = scalar_lea.vmem [#allocation2], %s873_s29 }
  0x13   : > { %s167_s8 = sshll.u32 %s157_s7, 4  ;;  %p1348_p0 = pnand %p1067_p13, %p1318_p4  ;;  %s168_s8 = int_to_ptr.vmem [resolvable:$true] %s167_s8 }
  0x14   : > { %p876_p1 = scmp.ge.s32.totalorder %s1249_s17, 1  ;;  %s154_s10 = scalar_lea.sflag [#allocation3], %s153_s28 }
  0x15   : > { %p1143_p2 = pneg %p1348_p0  ;;  %s1154_s11 = scalar_lea.vmem %s168_s8, 2048 }
  0x16   : > { %p1155_p3 = scmp.ne.s32.totalorder %s168_s8, %s1154_s11  ;;  %s1251_s18 = smov [#allocation2]  }
  0x17   : > { %s1159_s19 = sshll.u32 %s1251_s18, 4  ;;  %s1160_s19 = int_to_ptr.vmem [resolvable:$false] %s1159_s19 }
  0x18   : > { %p1157_p5 = pnand %p1155_p3, %p1143_p2  ;;  %s1161_s21 = scalar_lea.vmem %s1160_s19, 4096 }
  0x19   : > { %p1162_p7 = scmp.lt.s32.totalorder %s168_s8, %s1160_s19  ;;  %p1163_p10 = scmp.lt.s32.totalorder %s1161_s21, %s1154_s11 }
  0x1a   : > { %p1158_p6 = pneg %p1157_p5 }
  0x1b   : > { %p1164_p12 = por %p1163_p10, %p1162_p7 }
  0x1d   : > { %p1165_p4 = pnand %p1164_p12, %p1158_p6 }
  0x1f   : > { %1168 = shalt.err (!%p1165_p4)
}
  0x20   : > { %s1252_s22 = smov 64   ;;  %s1253_s23 = smov 4  }
  0x21   : > { %1062 = dma.hbm_to_vmem [thread:$0]  (!%p1348_p0), %s166_s6, 2048, %s168_s8, %s154_s10, %s1252_s22, %s1252_s22, %s1253_s23  }
  0x22   : > { %p175_p13 = scmp.lt.s32.totalorder %s1249_s17, 3 }
  0x24   : > { %p176_p2 = pnand %p876_p1, %p175_p13 }
  0x25   : > { %s1361_s28 = sand.u32 (!%p176_p2), 1, %s1233_s13  }
  0x26   : > { %179 = sbr.rel (%p176_p2) target bundleno = 305 (0x131), region = 32  ;;  %s877_s29 = sshll.u32 (!%p176_p2), %s1361_s28, 7 }
  0x27   : > { %s182_s30 = scalar_lea.sflag (!%p176_p2), [#allocation3], %s1361_s28  ;;  %s1367_s4 = scalar_lea.vmem (!%p176_p2), [#allocation2], %s877_s29 }
  0x2b   : > { %1220 = dma.done.wait (%p1324_p8), %s182_s30, 2048  }
  0x2c   : > { %1222 = vsyncadd (%p1324_p8), %s182_s30, 4294965248  ;;  %v1121_v0 = vld [vmem:[%s1578_s1 + $0x18] sm:$0xff]   ;;  %v1122_v1 = vld [vmem:[%s1578_s1 + $0x10] sm:$0xff]   ;;  %vm362_vm0 = vcmask 523264   ;;  %vm732_vm1 = vcmask 257024   ;;  %s1430_s21 = scalar_lea.vmem [#allocation5], %s877_s29 }
  0x2d   : > { %1007 = vmatprep.subr.bf16.mxu0 %v1121_v0  ;;  %1047 = vmatprep.subr.bf16.mxu1 %v1121_v0  ;;  %v1123_v2 = vld [vmem:[%s1578_s1 + $0x8] sm:$0xff]   ;;  %v1125_v3 = vld [vmem:[%s1367_s4] sm:$0xff]   ;;  %v1129_v8 = vld [vmem:[%s1367_s4 + $0x10] sm:$0xff]   ;;  %s986_s22 = sshll.u32 %s1241_s15, 11  ;;  %s782_s23 = sshll.u32 %s1430_s21, 4  ;;  %s1521_s23 = int_to_ptr.vmem [resolvable:$true] %s782_s23 }
  0x2e   : > { %1008 = vmatpush3.bf16.msra.mxu0 %v1121_v0  ;;  %1051 = vmatpush3.bf16.msra.mxu1 %v1121_v0  ;;  %v1126_v4 = vld [vmem:[%s1367_s4 + $0x40] sm:$0xff]   ;;  %v1127_v6 = vld [vmem:[%s1367_s4 + $0x8] sm:$0xff]   ;;  %v1130_v9 = vld [vmem:[%s1367_s4 + $0x50] sm:$0xff]   ;;  %s766_s15 = scalar_lea.sflag [#allocation4], %s1361_s28  ;;  %s1169_s5 = scalar_lea.vmem %s1521_s23, 2048 }
  0x2f   : > { %1009 = vmatprep.subr.bf16.mxu0 %v1122_v1  ;;  %1048 = vmatprep.subr.bf16.mxu1 %v1122_v1  ;;  %v1124_v5 = vld [vmem:[%s1578_s1] sm:$0xff]   ;;  %v1128_v7 = vld [vmem:[%s1367_s4 + $0x48] sm:$0xff]   ;;  %v1131_v10 = vld [vmem:[%s1367_s4 + $0x18] sm:$0xff]   ;;  %p1170_p8 = scmp.ne.s32.totalorder %s1521_s23, %s1169_s5  ;;  %s1254_s6 = smov [#allocation5]  }
  0x30   : > { %1015 = vmatprep.mubr.msk.bf16.mxu0 %vm362_vm0, %v1125_v3  ;;  %1031 = vmatprep.mubr.msk.bf16.mxu1 %vm362_vm0, %v1126_v4  ;;  %v1132_v11 = vld [vmem:[%s1367_s4 + $0x58] sm:$0xff]   ;;  %v1133_v12 = vld [vmem:[%s1367_s4 + $0x20] sm:$0xff]   ;;  %v1135_v14 = vld [vmem:[%s1367_s4 + $0x28] sm:$0xff]   ;;  %s1173_s7 = sshll.u32 %s1254_s6, 4  ;;  %s1174_s7 = int_to_ptr.vmem [resolvable:$false] %s1173_s7 }
  0x31   : > { %v1134_v13 = vld [vmem:[%s1367_s4 + $0x60] sm:$0xff]   ;;  %v1136_v15 = vld [vmem:[%s1367_s4 + $0x68] sm:$0xff]   ;;  %v1137_v16 = vld [vmem:[%s1367_s4 + $0x30] sm:$0xff]   ;;  %p1171_p12 = pnand %p1170_p8, %p1328_p9  ;;  %s1175_s8 = scalar_lea.vmem %s1174_s7, 4096 }
  0x32   : > { %1010 = vmatpush3.bf16.msra.mxu0 %v1122_v1  ;;  %1052 = vmatpush3.bf16.msra.mxu1 %v1122_v1  ;;  %v1138_v17 = vld [vmem:[%s1367_s4 + $0x70] sm:$0xff]   ;;  %v1139_v18 = vld [vmem:[%s1367_s4 + $0x38] sm:$0xff]   ;;  %v1420_v20 = vld [vmem:[%s1579_s2] ss:$0 sm:$0xff]  ;;  %p1176_p1 = scmp.lt.s32.totalorder %s1521_s23, %s1174_s7  ;;  %p1177_p3 = scmp.lt.s32.totalorder %s1175_s8, %s1169_s5 }
  0x33   : > { %1011 = vmatprep.subr.bf16.mxu0 %v1123_v2  ;;  %1049 = vmatprep.subr.bf16.mxu1 %v1123_v2  ;;  %v1140_v19 = vld [vmem:[%s1367_s4 + $0x78] sm:$0xff]   ;;  %s1519_s4 = scalar_lea.hbm %s1580_s3, %s986_s22  ;;  %p1172_p0 = pneg %p1171_p12 }
  0x34   : > { %p1178_p5 = por %p1177_p3, %p1176_p1 }
  0x36   : > { %1012 = vmatpush3.bf16.msra.mxu0 %v1123_v2  ;;  %1053 = vmatpush3.bf16.msra.mxu1 %v1123_v2  ;;  %p1179_p6 = pnand %p1178_p5, %p1172_p0 }
  0x37   : > { %1013 = vmatprep.subr.bf16.mxu0 %v1124_v5  ;;  %1050 = vmatprep.subr.bf16.mxu1 %v1124_v5 }
  0x3a   : > { %1014 = vmatpush3.bf16.msra.mxu0 %v1124_v5  ;;  %1054 = vmatpush3.bf16.msra.mxu1 %v1124_v5 }
  0x3d   : > { %1016 = vmatmul.mubr.msk.bf16.vlgmr.msra.gmra.mxu0 %vm362_vm0, %v1127_v6  ;;  %1032 = vmatmul.mubr.msk.bf16.vlgmr.msra.gmra.mxu1 %vm362_vm0, %v1128_v7 }
  0x3e   : > { %1019 = vmatprep.mubr.msk.bf16.mxu0 %vm362_vm0, %v1129_v8  ;;  %1035 = vmatprep.mubr.msk.bf16.mxu1 %vm362_vm0, %v1130_v9 }
  0x45   : > { %1020 = vmatmul.mubr.msk.bf16.gmra.mxu0 %vm362_vm0, %v1131_v10  ;;  %1036 = vmatmul.mubr.msk.bf16.gmra.mxu1 %vm362_vm0, %v1132_v11 }
  0x46   : > { %1023 = vmatprep.mubr.msk.bf16.mxu0 %vm362_vm0, %v1133_v12  ;;  %1039 = vmatprep.mubr.msk.bf16.mxu1 %vm362_vm0, %v1134_v13 }
  0x4d   : > { %1024 = vmatmul.mubr.msk.bf16.gmra.mxu0 %vm362_vm0, %v1135_v14  ;;  %1040 = vmatmul.mubr.msk.bf16.gmra.mxu1 %vm362_vm0, %v1136_v15 }
  0x4e   : > { %1027 = vmatprep.mubr.msk.bf16.mxu0 %vm362_vm0, %v1137_v16  ;;  %1043 = vmatprep.mubr.msk.bf16.mxu1 %vm362_vm0, %v1138_v17 }
  0x55   : > { %1028 = vmatmul.mubr.msk.bf16.gmra.mxu0 %vm362_vm0, %v1139_v18  ;;  %1044 = vmatmul.mubr.msk.bf16.gmra.mxu1 %vm362_vm0, %v1140_v19 }
  0xfd   : > { %v1017_v21 = vpop.f32.mrf.mxu0  ;;  %v1033_v22 = vpop.f32.mrf.mxu1 }
  0xfe   : > { %v454_v23 = vadd.f32 %v1017_v21, %v1420_v20  ;;  %v518_v24 = vadd.f32 %v1033_v22, %v1420_v20 }
  0xff   : > { %v445_v25 = vpop.f32.mrf.mxu0  ;;  %v509_v26 = vpop.f32.mrf.mxu1 }
 0x100   : > { %v574_v27 = vmax.f32 %v454_v23, 0.0  ;;  %v590_v28 = vmax.f32 %v518_v24, 0.0  ;;  %v446_v29 = vadd.f32 %v1420_v20, %v445_v25  ;;  %v510_v30 = vadd.f32 %v1420_v20, %v509_v26 }
 0x101   : > { %v1018_v31 = vpop.f32.mrf.mxu0  ;;  %v1034_v32 = vpop.f32.mrf.mxu1 }
 0x102   : > { %v956_v33 = vpack.c.bf16 %v574_v27, %v574_v27  ;;  %v972_v34 = vpack.c.bf16 %v590_v28, %v590_v28  ;;  %v572_v35 = vmax.f32 %v446_v29, 0.0  ;;  %v588_v36 = vmax.f32 %v510_v30, 0.0 }
 0x103   : > { %v457_v37 = vadd.f32 %v1018_v31, %v1420_v20  ;;  %v521_v38 = vadd.f32 %v1034_v32, %v1420_v20  ;;  %v448_v39 = vpop.f32.mrf.mxu0  ;;  %v512_v40 = vpop.f32.mrf.mxu1 }
 0x104   : > { %735 = vst.msk [vmem:[%s1430_s21 + $0x8] sm:$0xf] %vm732_vm1, %v956_v33  ;;  %751 = vst.msk [vmem:[%s1430_s21 + $0x48] sm:$0xf] %vm732_vm1, %v972_v34  ;;  %v954_v41 = vpack.c.bf16 %v572_v35, %v572_v35  ;;  %v970_v42 = vpack.c.bf16 %v588_v36, %v588_v36  ;;  %v449_v43 = vadd.f32 %v1420_v20, %v448_v39 }
 0x105   : > { %v513_v44 = vadd.f32 %v1420_v20, %v512_v40  ;;  %v575_v45 = vmax.f32 %v457_v37, 0.0  ;;  %v591_v46 = vmax.f32 %v521_v38, 0.0  ;;  %v1021_v47 = vpop.f32.mrf.mxu0  ;;  %v1037_v48 = vpop.f32.mrf.mxu1 }
 0x106   : > { %733 = vst.msk [vmem:[%s1430_s21] sm:$0xf] %vm732_vm1, %v954_v41  ;;  %749 = vst.msk [vmem:[%s1430_s21 + $0x40] sm:$0xf] %vm732_vm1, %v970_v42  ;;  %v573_v49 = vmax.f32 %v449_v43, 0.0  ;;  %v470_v51 = vadd.f32 %v1021_v47, %v1420_v20  ;;  %v534_v52 = vadd.f32 %v1037_v48, %v1420_v20 }
 0x107   : > { %v589_v50 = vmax.f32 %v513_v44, 0.0  ;;  %v957_v53 = vpack.c.bf16 %v575_v45, %v575_v45  ;;  %v973_v54 = vpack.c.bf16 %v591_v46, %v591_v46  ;;  %v461_v55 = vpop.f32.mrf.mxu0  ;;  %v525_v56 = vpop.f32.mrf.mxu1 }
 0x108   : > { %v955_v57 = vpack.c.bf16 %v573_v49, %v573_v49  ;;  %v578_v59 = vmax.f32 %v470_v51, 0.0  ;;  %v594_v60 = vmax.f32 %v534_v52, 0.0  ;;  %v462_v61 = vadd.f32 %v1420_v20, %v461_v55 }
 0x109   : > { %v971_v58 = vpack.c.bf16 %v589_v50, %v589_v50  ;;  %736 = vst.msk [vmem:[%s1430_s21 + $0xc] sm:$0xf] %vm732_vm1, %v957_v53  ;;  %752 = vst.msk [vmem:[%s1430_s21 + $0x4c] sm:$0xf] %vm732_vm1, %v973_v54  ;;  %v526_v62 = vadd.f32 %v1420_v20, %v525_v56  ;;  %v1022_v63 = vpop.f32.mrf.mxu0  ;;  %v1038_v0 = vpop.f32.mrf.mxu1 }
 0x10a   : > { %734 = vst.msk [vmem:[%s1430_s21 + $0x4] sm:$0xf] %vm732_vm1, %v955_v57  ;;  %v960_v1 = vpack.c.bf16 %v578_v59, %v578_v59  ;;  %v976_v2 = vpack.c.bf16 %v594_v60, %v594_v60  ;;  %v473_v3 = vadd.f32 %v1022_v63, %v1420_v20  ;;  %v537_v4 = vadd.f32 %v1038_v0, %v1420_v20 }
 0x10b   : > { %750 = vst.msk [vmem:[%s1430_s21 + $0x44] sm:$0xf] %vm732_vm1, %v971_v58  ;;  %v576_v5 = vmax.f32 %v462_v61, 0.0  ;;  %v592_v6 = vmax.f32 %v526_v62, 0.0  ;;  %v464_v7 = vpop.f32.mrf.mxu0  ;;  %v528_v8 = vpop.f32.mrf.mxu1 }
 0x10c   : > { %739 = vst.msk [vmem:[%s1430_s21 + $0x18] sm:$0xf] %vm732_vm1, %v960_v1  ;;  %755 = vst.msk [vmem:[%s1430_s21 + $0x58] sm:$0xf] %vm732_vm1, %v976_v2  ;;  %v579_v9 = vmax.f32 %v473_v3, 0.0  ;;  %v595_v10 = vmax.f32 %v537_v4, 0.0  ;;  %v465_v11 = vadd.f32 %v1420_v20, %v464_v7  ;;  %v529_v12 = vadd.f32 %v1420_v20, %v528_v8 }
 0x10d   : > { %v958_v13 = vpack.c.bf16 %v576_v5, %v576_v5  ;;  %v974_v14 = vpack.c.bf16 %v592_v6, %v592_v6  ;;  %v1025_v15 = vpop.f32.mrf.mxu0  ;;  %v1041_v16 = vpop.f32.mrf.mxu1 }
 0x10e   : > { %v961_v17 = vpack.c.bf16 %v579_v9, %v579_v9  ;;  %v977_v18 = vpack.c.bf16 %v595_v10, %v595_v10  ;;  %v577_v19 = vmax.f32 %v465_v11, 0.0  ;;  %v593_v21 = vmax.f32 %v529_v12, 0.0 }
 0x10f   : > { %737 = vst.msk [vmem:[%s1430_s21 + $0x10] sm:$0xf] %vm732_vm1, %v958_v13  ;;  %753 = vst.msk [vmem:[%s1430_s21 + $0x50] sm:$0xf] %vm732_vm1, %v974_v14  ;;  %v486_v22 = vadd.f32 %v1025_v15, %v1420_v20  ;;  %v550_v23 = vadd.f32 %v1041_v16, %v1420_v20  ;;  %v477_v24 = vpop.f32.mrf.mxu0  ;;  %v541_v25 = vpop.f32.mrf.mxu1 }
 0x110   : > { %740 = vst.msk [vmem:[%s1430_s21 + $0x1c] sm:$0xf] %vm732_vm1, %v961_v17  ;;  %756 = vst.msk [vmem:[%s1430_s21 + $0x5c] sm:$0xf] %vm732_vm1, %v977_v18  ;;  %v959_v26 = vpack.c.bf16 %v577_v19, %v577_v19  ;;  %v975_v27 = vpack.c.bf16 %v593_v21, %v593_v21  ;;  %v478_v28 = vadd.f32 %v1420_v20, %v477_v24 }
 0x111   : > { %v542_v29 = vadd.f32 %v1420_v20, %v541_v25  ;;  %v582_v30 = vmax.f32 %v486_v22, 0.0  ;;  %v598_v31 = vmax.f32 %v550_v23, 0.0  ;;  %v1026_v32 = vpop.f32.mrf.mxu0  ;;  %v1042_v33 = vpop.f32.mrf.mxu1 }
 0x112   : > { %738 = vst.msk [vmem:[%s1430_s21 + $0x14] sm:$0xf] %vm732_vm1, %v959_v26  ;;  %754 = vst.msk [vmem:[%s1430_s21 + $0x54] sm:$0xf] %vm732_vm1, %v975_v27  ;;  %v580_v34 = vmax.f32 %v478_v28, 0.0  ;;  %v489_v36 = vadd.f32 %v1026_v32, %v1420_v20  ;;  %v553_v37 = vadd.f32 %v1042_v33, %v1420_v20 }
 0x113   : > { %v596_v35 = vmax.f32 %v542_v29, 0.0  ;;  %v964_v38 = vpack.c.bf16 %v582_v30, %v582_v30  ;;  %v980_v39 = vpack.c.bf16 %v598_v31, %v598_v31  ;;  %v480_v40 = vpop.f32.mrf.mxu0  ;;  %v544_v41 = vpop.f32.mrf.mxu1 }
 0x114   : > { %v962_v42 = vpack.c.bf16 %v580_v34, %v580_v34  ;;  %v583_v44 = vmax.f32 %v489_v36, 0.0  ;;  %v599_v45 = vmax.f32 %v553_v37, 0.0  ;;  %v481_v46 = vadd.f32 %v1420_v20, %v480_v40 }
 0x115   : > { %v978_v43 = vpack.c.bf16 %v596_v35, %v596_v35  ;;  %743 = vst.msk [vmem:[%s1430_s21 + $0x28] sm:$0xf] %vm732_vm1, %v964_v38  ;;  %759 = vst.msk [vmem:[%s1430_s21 + $0x68] sm:$0xf] %vm732_vm1, %v980_v39  ;;  %v545_v47 = vadd.f32 %v1420_v20, %v544_v41  ;;  %v1029_v48 = vpop.f32.mrf.mxu0  ;;  %v1045_v49 = vpop.f32.mrf.mxu1 }
 0x116   : > { %741 = vst.msk [vmem:[%s1430_s21 + $0x20] sm:$0xf] %vm732_vm1, %v962_v42  ;;  %v965_v50 = vpack.c.bf16 %v583_v44, %v583_v44  ;;  %v981_v51 = vpack.c.bf16 %v599_v45, %v599_v45  ;;  %v502_v52 = vadd.f32 %v1029_v48, %v1420_v20  ;;  %v566_v53 = vadd.f32 %v1045_v49, %v1420_v20 }
 0x117   : > { %757 = vst.msk [vmem:[%s1430_s21 + $0x60] sm:$0xf] %vm732_vm1, %v978_v43  ;;  %v581_v54 = vmax.f32 %v481_v46, 0.0  ;;  %v597_v55 = vmax.f32 %v545_v47, 0.0  ;;  %v493_v56 = vpop.f32.mrf.mxu0  ;;  %v557_v57 = vpop.f32.mrf.mxu1 }
 0x118   : > { %744 = vst.msk [vmem:[%s1430_s21 + $0x2c] sm:$0xf] %vm732_vm1, %v965_v50  ;;  %760 = vst.msk [vmem:[%s1430_s21 + $0x6c] sm:$0xf] %vm732_vm1, %v981_v51  ;;  %v586_v58 = vmax.f32 %v502_v52, 0.0  ;;  %v602_v59 = vmax.f32 %v566_v53, 0.0  ;;  %v494_v60 = vadd.f32 %v1420_v20, %v493_v56  ;;  %v558_v61 = vadd.f32 %v1420_v20, %v557_v57 }
 0x119   : > { %v963_v62 = vpack.c.bf16 %v581_v54, %v581_v54  ;;  %v979_v63 = vpack.c.bf16 %v597_v55, %v597_v55  ;;  %v1030_v0 = vpop.f32.mrf.mxu0  ;;  %v1046_v1 = vpop.f32.mrf.mxu1 }
 0x11a   : > { %v968_v2 = vpack.c.bf16 %v586_v58, %v586_v58  ;;  %v984_v3 = vpack.c.bf16 %v602_v59, %v602_v59  ;;  %v584_v4 = vmax.f32 %v494_v60, 0.0  ;;  %v600_v5 = vmax.f32 %v558_v61, 0.0 }
 0x11b   : > { %742 = vst.msk [vmem:[%s1430_s21 + $0x24] sm:$0xf] %vm732_vm1, %v963_v62  ;;  %758 = vst.msk [vmem:[%s1430_s21 + $0x64] sm:$0xf] %vm732_vm1, %v979_v63  ;;  %v505_v6 = vadd.f32 %v1030_v0, %v1420_v20  ;;  %v569_v7 = vadd.f32 %v1046_v1, %v1420_v20  ;;  %v496_v8 = vpop.f32.mrf.mxu0  ;;  %v560_v9 = vpop.f32.mrf.mxu1 }
 0x11c   : > { %747 = vst.msk [vmem:[%s1430_s21 + $0x38] sm:$0xf] %vm732_vm1, %v968_v2  ;;  %763 = vst.msk [vmem:[%s1430_s21 + $0x78] sm:$0xf] %vm732_vm1, %v984_v3  ;;  %v966_v10 = vpack.c.bf16 %v584_v4, %v584_v4  ;;  %v982_v11 = vpack.c.bf16 %v600_v5, %v600_v5  ;;  %v497_v12 = vadd.f32 %v1420_v20, %v496_v8 }
 0x11d   : > { %v561_v13 = vadd.f32 %v1420_v20, %v560_v9  ;;  %v587_v14 = vmax.f32 %v505_v6, 0.0  ;;  %v603_v15 = vmax.f32 %v569_v7, 0.0 }
 0x11e   : > { %745 = vst.msk [vmem:[%s1430_s21 + $0x30] sm:$0xf] %vm732_vm1, %v966_v10  ;;  %761 = vst.msk [vmem:[%s1430_s21 + $0x70] sm:$0xf] %vm732_vm1, %v982_v11  ;;  %v585_v16 = vmax.f32 %v497_v12, 0.0 }
 0x11f   : > { %v601_v17 = vmax.f32 %v561_v13, 0.0  ;;  %v969_v18 = vpack.c.bf16 %v587_v14, %v587_v14  ;;  %v985_v19 = vpack.c.bf16 %v603_v15, %v603_v15 }
 0x120   : > { %v967_v20 = vpack.c.bf16 %v585_v16, %v585_v16 }
 0x121   : > { %v983_v21 = vpack.c.bf16 %v601_v17, %v601_v17  ;;  %748 = vst.msk [vmem:[%s1430_s21 + $0x3c] sm:$0xf] %vm732_vm1, %v969_v18  ;;  %764 = vst.msk [vmem:[%s1430_s21 + $0x7c] sm:$0xf] %vm732_vm1, %v985_v19 }
 0x122   : > { %746 = vst.msk [vmem:[%s1430_s21 + $0x34] sm:$0xf] %vm732_vm1, %v967_v20 }
 0x123   : > { %762 = vst.msk [vmem:[%s1430_s21 + $0x74] sm:$0xf] %vm732_vm1, %v983_v21 }
 0x124   : > { %1182 = shalt.err (!%p1179_p6)
}
 0x125   : > { %s1183_s9 = scalar_lea.hbm %s1519_s4, 2048  ;;  %s1187_s11 = scalar_lea.hbm %s1580_s3, 4096 }
 0x126   : > { %p1184_p7 = scmp.ne.s32.totalorder %s1519_s4, %s1183_s9  ;;  %p1188_p13 = scmp.lt.s32.totalorder %s1519_s4, %s1580_s3 }
 0x127   : > { %p1189_p2 = scmp.lt.s32.totalorder %s1187_s11, %s1183_s9 }
 0x128   : > { %p1185_p10 = pnand %p1184_p7, %p1328_p9 }
 0x129   : > { %p1190_p8 = por %p1189_p2, %p1188_p13 }
 0x12a   : > { %p1186_p4 = pneg %p1185_p10 }
 0x12c   : > { %p1191_p12 = pnand %p1190_p8, %p1186_p4 }
 0x12e   : > { %1194 = shalt.err (!%p1191_p12)
}
 0x12f   : > { %s1255_s21 = smov 64   ;;  %s1256_s22 = smov 4  }
 0x130   : > { %1057 = dma.vmem_to_hbm [thread:$0]  (%p1328_p9), %s1521_s23, 2048, %s1519_s4, %s766_s15, %s1255_s21, %s1255_s21, %s1256_s22  }
 0x131 PF: > { %s797_s29 = sand.u32 1, %s1229_s12   ;;  %p1586_p0 = scmp.ge.s32.totalorder %s1249_s17, 2 }
 0x132   : > { %s798_s30 = scalar_lea.sflag [#allocation4], %s797_s29 }
 0x133   : > { %p1064_p1 = pnand %p1586_p0, %p1335_p11 }
 0x135   : > { %p1065_p3 = pneg %p1064_p1 }
 0x137   : > { %1224 = dma.done.wait (%p1065_p3), %s798_s30, 2048  }
 0x138   : > { %1226 = vsyncadd (%p1065_p3), %s798_s30, 4294965248  ;;  %s19_s17 = sadd.s32 1, %s1249_s17   ;;  %s1587_s12 = smov %s1233_s13 }
 0x139   : > { %p16_p5 = scmp.ge.s32.totalorder %s19_s17, 4   ;;  %s1588_s13 = smov %s1237_s14 }
 0x13a   : > { %s1589_s14 = smov %s1333_s26  ;;  %s1590_s15 = smov %s1245_s16 }
 0x13b   : > { %s1591_s16 = smov %s1593_s20  ;;  %18 = sbr.rel (!%p16_p5) target bundleno = 6 (0x6), region = 77 }
 0x140   :  { %803 = vsyncpa [#allocation3], 1 }
 0x141   :  { %805 = vsyncpa [#allocation3 + $0x1], 1 }
 0x142   :  { %806 = vsyncpa [#allocation4], 1 }
 0x143   :  { %808 = vsyncpa [#allocation4 + $0x1], 1 }

</bundles_post_ra>
